<compile_context>
chip_gen: v7x
topology: tpu7x:2x2x1
jax: 0.10.0
libtpu: 0.0.40
codegen_flags: <defaults>
</compile_context>

<pallas_src>
import functools
import math

import jax
import jax.numpy as jnp
from jax.experimental import pallas as pl
from jax.experimental.pallas import tpu as pltpu


def _round_up(x, m):
    return ((x + m - 1) // m) * m


def _pick_divisor_tile(total, max_tile, quantum):
    """Largest multiple of `quantum` <= max_tile that divides `total`
    (`total` must itself be a multiple of `quantum`)."""
    best = quantum
    t = quantum
    while t <= min(total, max_tile):
        if total % t == 0:
            best = t
        t += quantum
    return best


def _pick_tile_with_padding(n, max_tile, quantum, waste_num=1, waste_den=16):
    """Pick (tile, padded_n): largest tile (multiple of `quantum`, <= max_tile)
    whose zero-padding overhead is <= waste_num/waste_den of n."""
    n_q = _round_up(n, quantum)
    if n_q <= max_tile:
        return n_q, n_q
    tile = quantum
    t = max_tile - (max_tile % quantum)
    while t >= quantum:
        pad = _round_up(n_q, t) - n_q
        if pad * waste_den <= n_q * waste_num:
            tile = t
            break
        t -= quantum
    return tile, _round_up(n_q, tile)


# ---------------------------------------------------------------------------
# Stage 1: support = x @ W   ((rows, f_out)-tiled, bf16 in, f32 acc, bf16 out)
# ---------------------------------------------------------------------------
def _support_kernel(x_ref, w_ref, o_ref):
    o_ref[...] = jnp.dot(
        x_ref[...], w_ref[...], preferred_element_type=jnp.float32
    ).astype(o_ref.dtype)


# ---------------------------------------------------------------------------
# Stage 2: out = adj @ support + bias
#   Grid (rows, reduction) with reduction last; the f32 output block is the
#   accumulator (its block index ignores k), seeded with the bias at k == 0.
# ---------------------------------------------------------------------------
def _aggregate_kernel(adj_ref, s_ref, b_ref, o_ref, *, tk, support_resident):
    k = pl.program_id(1)

    @pl.when(k == 0)
    def _():
        o_ref[...] = jnp.broadcast_to(b_ref[...], o_ref.shape)

    if support_resident:
        # Whole support matrix is VMEM-resident; slice out the k-th row block.
        start = pl.multiple_of(k * tk, tk)
        s_blk = s_ref[pl.ds(start, tk), :]
    else:
        s_blk = s_ref[...]

    o_ref[...] += jnp.dot(adj_ref[...], s_blk, preferred_element_type=jnp.float32)


def graph_convolution(x, adj, weight, bias, *, tm_max=512, tk_max=2048):
    """Pallas GCN layer. x:[N,F_in]  adj:[N,N] dense  weight:[F_in,F_out]  bias:[F_out]."""
    n, f_in = x.shape
    f_out = weight.shape[1]

    # ---- tile / padding geometry ------------------------------------------
    # Lane-dense output: pad F_out up to a multiple of 128 (>= 128).
    f_out_pad = _round_up(max(f_out, 128), 128)

    # Output-row tile: multiple of 16 (bf16 adj packs (16,128) per vreg).
    tm, n_pad_m = _pick_tile_with_padding(n, tm_max, 16)
    # v7x megacore: the row axis is the "parallel" one -- ensure >= 2 row
    # blocks when N allows it so neither TensorCore idles (no padding waste).
    if n_pad_m // tm < 2 and n > 16:
        n16 = _round_up(n, 16)
        tm = _pick_divisor_tile(n16, n16 // 2, 16)
        n_pad_m = n16

    # adj reduction tile: multiple of 128 (lane axis).
    tk, n_pad_k = _pick_tile_with_padding(n, tk_max, 128)

    # ---- zero-padded, dtype-converted operands (cast BEFORE padding) -------
    x_p = jnp.pad(x.astype(jnp.bfloat16), ((0, n_pad_k - n), (0, 0)))
    w_p = jnp.pad(weight.astype(jnp.bfloat16), ((0, 0), (0, f_out_pad - f_out)))
    adj_p = jnp.pad(adj.astype(jnp.bfloat16), ((0, n_pad_m - n), (0, n_pad_k - n)))
    b_p = jnp.pad(bias.astype(jnp.float32), (0, f_out_pad - f_out)).reshape(1, f_out_pad)

    # ---- stage 1: support = x @ W ------------------------------------------
    tk1 = _pick_divisor_tile(n_pad_k, 512, 128)
    tn1 = _pick_divisor_tile(f_out_pad, 512, 128)
    s1_vmem = 2 * tk1 * f_in * 2 + 2 * f_in * tn1 * 2 + 2 * tk1 * tn1 * 2
    s1_vmem_limit = int(min(max(s1_vmem + (4 << 20), 16 << 20), 40 << 20))
    # TODO(synk): add an f_in reduction grid axis if f_in ever gets large
    # enough for the (tk1, f_in)/(f_in, tn1) blocks to stress VMEM.

    support = pl.pallas_call(
        _support_kernel,
        out_shape=jax.ShapeDtypeStruct((n_pad_k, f_out_pad), jnp.bfloat16),
        grid_spec=pltpu.PrefetchScalarGridSpec(
            num_scalar_prefetch=0,
            grid=(n_pad_k // tk1, f_out_pad // tn1),
            in_specs=[
                pl.BlockSpec((tk1, f_in), lambda i, j: (i, 0)),
                pl.BlockSpec((f_in, tn1), lambda i, j: (0, j)),
            ],
            out_specs=pl.BlockSpec((tk1, tn1), lambda i, j: (i, j)),
        ),
        compiler_params=pltpu.CompilerParams(
            dimension_semantics=("parallel", "parallel"),
            vmem_limit_bytes=s1_vmem_limit,
        ),
        cost_estimate=pl.CostEstimate(
            flops=2 * n_pad_k * f_in * f_out_pad,
            transcendentals=0,
            bytes_accessed=(
                (f_out_pad // tn1) * n_pad_k * f_in * 2
                + (n_pad_k // tk1) * f_in * f_out_pad * 2
                + n_pad_k * f_out_pad * 2
            ),
        ),
    )(x_p, w_p)

    # ---- stage 2: out = adj @ support + bias --------------------------------
    support_bytes = n_pad_k * f_out_pad * 2
    support_resident = support_bytes <= (8 << 20)

    grid = (n_pad_m // tm, n_pad_k // tk)

    if support_resident:
        # Whole support matrix pinned in VMEM (constant block index) -> the
        # dominant adj stream is the only per-step HBM traffic.
        s_spec = pl.BlockSpec((n_pad_k, f_out_pad), lambda i, k: (0, 0))
        s_vmem = 2 * support_bytes              # conservative: double-buffered
        s_hbm = support_bytes
    else:
        s_spec = pl.BlockSpec((tk, f_out_pad), lambda i, k: (k, 0))
        s_vmem = 2 * tk * f_out_pad * 2
        s_hbm = (n_pad_m // tm) * n_pad_k * f_out_pad * 2

    vmem_bytes = (
        2 * tm * tk * 2             # adj tiles, double-buffered bf16
        + s_vmem                    # support (resident or streamed)
        + 2 * tm * f_out_pad * 4    # resident f32 output block
        + 2 * 8 * f_out_pad * 4     # bias (sublane-padded)
    )
    vmem_limit = int(min(max(vmem_bytes + (4 << 20), 16 << 20), 40 << 20))

    kernel = functools.partial(
        _aggregate_kernel, tk=tk, support_resident=support_resident
    )

    out_p = pl.pallas_call(
        kernel,
        out_shape=jax.ShapeDtypeStruct((n_pad_m, f_out_pad), jnp.float32),
        grid_spec=pltpu.PrefetchScalarGridSpec(
            num_scalar_prefetch=0,
            grid=grid,                                  # (rows, reduction) -- reduction last
            in_specs=[
                pl.BlockSpec((tm, tk), lambda i, k: (i, k)),          # adj tile
                s_spec,                                                # support
                pl.BlockSpec((1, f_out_pad), lambda i, k: (0, 0)),     # bias (resident)
            ],
            out_specs=pl.BlockSpec((tm, f_out_pad), lambda i, k: (i, 0)),
        ),
        compiler_params=pltpu.CompilerParams(
            dimension_semantics=("parallel", "arbitrary"),
            vmem_limit_bytes=vmem_limit,
        ),
        cost_estimate=pl.CostEstimate(
            flops=2 * n_pad_m * n_pad_k * f_out_pad,
            transcendentals=0,
            bytes_accessed=(
                n_pad_m * n_pad_k * 2          # adj (bf16, dominant)
                + s_hbm                        # support (once if resident)
                + n_pad_m * f_out_pad * 4      # output (f32)
                + f_out_pad * 4                # bias
            ),
        ),
    )(adj_p, support, b_p)

    return out_p[:n, :f_out]


def init_params(key, in_features, out_features):
    """Matches the module's reset_parameters():
    nn.init.kaiming_uniform_(weight) with defaults (a=0, fan_in = weight.size(1)
    = out_features, gain = sqrt(2)), and zero bias."""
    bound = math.sqrt(2.0) * math.sqrt(3.0 / out_features)
    w = jax.random.uniform(
        key, (in_features, out_features), jnp.float32, minval=-bound, maxval=bound
    )
    b = jnp.zeros((out_features,), jnp.float32)
    return w, b


if __name__ == "__main__":
    key = jax.random.PRNGKey(0)
    k_x, k_adj, k_w = jax.random.split(key, 3)

    num_nodes = 8
    in_features = 16
    out_features = 32

    # Node features.
    x = jax.random.normal(k_x, (num_nodes, in_features), jnp.float32)

    # Normalized dense adjacency (self-loops + row normalization), standing in
    # for the sparse adj that torch.sparse.mm would consume (same semantics).
    a = (jax.random.uniform(k_adj, (num_nodes, num_nodes)) > 0.5).astype(jnp.float32)
    a = a + jnp.eye(num_nodes, dtype=jnp.float32)
    adj = a / jnp.sum(a, axis=1, keepdims=True)

    weight, bias = init_params(k_w, in_features, out_features)

    out = graph_convolution(x, adj, weight, bias)
    out = jax.block_until_ready(out)

    # Mirrored-precision reference (same bf16 casts, f32 accumulate).
    support_ref = jnp.dot(
        x.astype(jnp.bfloat16), weight.astype(jnp.bfloat16),
        preferred_element_type=jnp.float32,
    ).astype(jnp.bfloat16)
    ref = jnp.dot(
        adj.astype(jnp.bfloat16), support_ref, preferred_element_type=jnp.float32
    ) + bias[None, :]
    # Full-f32 reference (coarse check on overall semantics).
    ref_f32 = adj @ (x @ weight) + bias[None, :]

    assert out.shape == (num_nodes, out_features)
    assert jnp.allclose(out, ref, atol=2e-2, rtol=2e-2), \
        float(jnp.max(jnp.abs(out - ref)))
    assert jnp.allclose(out, ref_f32, atol=6e-2, rtol=6e-2), \
        float(jnp.max(jnp.abs(out - ref_f32)))

    print("KERNEL_OK")
</pallas_src>

<mosaic_0001>
module attributes {stable_mosaic.version = 11 : i64} {
  func.func @_support_kernel(%arg0: i32, %arg1: i32, %arg2: memref<128x16xbf16, #tpu.memory_space<vmem>>, %arg3: memref<16x128xbf16, #tpu.memory_space<vmem>>, %arg4: memref<128x128xbf16, #tpu.memory_space<vmem>>) attributes {dimension_semantics = [#tpu.dimension_semantics<parallel>, #tpu.dimension_semantics<parallel>], iteration_bounds = array<i64: 1, 1>, scalar_prefetch = 0 : i64, scratch_operands = 0 : i64, tpu.core_type = #tpu.core_type<tc>, window_params = [{transform_indices = @transform_0, window_bounds = array<i64: 128, 16>}, {transform_indices = @transform_1, window_bounds = array<i64: 16, 128>}, {transform_indices = @transform_2, window_bounds = array<i64: 128, 128>}]} {
    %c0 = arith.constant 0 : index
    %c0_0 = arith.constant 0 : index
    %0 = vector.load %arg2[%c0, %c0_0] : memref<128x16xbf16, #tpu.memory_space<vmem>>, vector<128x16xbf16>
    %c0_1 = arith.constant 0 : index
    %c0_2 = arith.constant 0 : index
    %1 = vector.load %arg3[%c0_1, %c0_2] : memref<16x128xbf16, #tpu.memory_space<vmem>>, vector<16x128xbf16>
    %cst = arith.constant dense<0.000000e+00> : vector<128x128xf32>
    %2 = tpu.matmul %0, %1, %cst {dimension_numbers = #tpu.dot_dimension_numbers<[1], [0], [0], [1], [0, 0, 1, 1], [], []>} : vector<128x16xbf16>, vector<16x128xbf16>, vector<128x128xf32> -> vector<128x128xf32>
    %3 = arith.truncf %2 : vector<128x128xf32> to vector<128x128xbf16>
    %c0_3 = arith.constant 0 : index
    %c0_4 = arith.constant 0 : index
    %4 = vector.load %arg4[%c0_3, %c0_4] : memref<128x128xbf16, #tpu.memory_space<vmem>>, vector<128x128xbf16>
    tpu.vector_store %arg4[%c0_3, %c0_4], %3 {strides = array<i32>} : memref<128x128xbf16, #tpu.memory_space<vmem>>, vector<128x128xbf16>,
    return
  }
  func.func @transform_0(%arg0: i32, %arg1: i32) -> (i32, i32) {
    %c0_i32 = arith.constant 0 : i32
    %c0_i32_0 = arith.constant 0 : i32
    return %arg0, %c0_i32 : i32, i32
  }
  func.func @transform_1(%arg0: i32, %arg1: i32) -> (i32, i32) {
    %c0_i32 = arith.constant 0 : i32
    %c0_i32_0 = arith.constant 0 : i32
    return %c0_i32, %arg1 : i32, i32
  }
  func.func @transform_2(%arg0: i32, %arg1: i32) -> (i32, i32) {
    %c0_i32 = arith.constant 0 : i32
    return %arg0, %arg1 : i32, i32
  }
}

</mosaic_0001>

<bundles_post_ra>
// kernel: tpu_custom_call.1
= control target key start
LH: loop header
LB: loop body
LE: loop exit
PB: predicated region body
PF: predicated region fallthrough
CT: control target
= control target key end

     0   :  { %vm77_vm0 = vcmask 130048   ;;  %s521_s0 = inlined_call_operand.vmem [shape: bf16[128,16], index: 0, kind: input, shape index: {}]   ;;  %s522_s1 = inlined_call_operand.vmem [shape: bf16[16,128], index: 1, kind: input, shape index: {}]   ;;  %s523_s2 = inlined_call_operand.hbm [shape: bf16[128,128], index: 2, kind: output, shape index: {}]  }
   0x1   :  { %v423_v0 = vld [vmem:[%s522_s1] sm:$0xff]   ;;  %v426_v3 = vld [vmem:[%s521_s0 + $0x8] sm:$0xff]   ;;  %v428_v5 = vld [vmem:[%s521_s0 + $0x10] sm:$0xff]  }
   0x2   :  { %v424_v1 = vld [vmem:[%s521_s0] sm:$0xff]   ;;  %400 = vmatprep.subr.bf16.mxu0 %v423_v0  ;;  %418 = vmatprep.subr.bf16.mxu1 %v423_v0  ;;  %v427_v4 = vld [vmem:[%s521_s0 + $0x28] sm:$0xff]   ;;  %v429_v6 = vld [vmem:[%s521_s0 + $0x30] sm:$0xff]  }
   0x3   :  { %v425_v2 = vld [vmem:[%s521_s0 + $0x20] sm:$0xff]   ;;  %401 = vmatpush3.bf16.msra.mxu0 %v423_v0  ;;  %419 = vmatpush3.bf16.msra.mxu1 %v423_v0 }
   0x4   :  { %402 = vmatprep.mubr.msk.bf16.mxu0 %vm77_vm0, %v424_v1  ;;  %410 = vmatprep.mubr.msk.bf16.mxu1 %vm77_vm0, %v425_v2 }
   0x6   :  { %403 = vmatmul.mubr.msk.bf16.vlgmr.msra.gmra.mrb[0].mxu0 %vm77_vm0, %v426_v3  ;;  %411 = vmatmul.mubr.msk.bf16.vlgmr.msra.gmra.mrb[0].mxu1 %vm77_vm0, %v427_v4 }
   0x7   :  { %406 = vmatprep.mubr.msk.bf16.mxu0 %vm77_vm0, %v428_v5  ;;  %414 = vmatprep.mubr.msk.bf16.mxu1 %vm77_vm0, %v429_v6 }
   0x8   :  { %7 = vsyncpa [#allocation3], 0  ;;  %v430_v7 = vld [vmem:[%s521_s0 + $0x18] sm:$0xff]  }
   0x9   :  { %v431_v8 = vld [vmem:[%s521_s0 + $0x38] sm:$0xff]   ;;  %s456_s0 = smov [#allocation2]  }
   0xa   :  { %s284_s26 = sshll.u32 %s456_s0, 4  ;;  %s285_s26 = int_to_ptr.vmem [resolvable:$true] %s284_s26 }
   0xb   :  { %s432_s27 = scalar_lea.vmem %s285_s26, 1024  ;;  %p437_p1 = scmp.lt.s32.totalorder %s285_s26, %s285_s26 }
   0xc   :  { %p433_p0 = scmp.ne.s32.totalorder %s285_s26, %s432_s27  ;;  %p438_p2 = scmp.lt.s32.totalorder %s432_s27, %s432_s27 }
   0xe   :  { %407 = vmatmul.mubr.msk.bf16.gmra.mrb[4].mxu0 %vm77_vm0, %v430_v7  ;;  %415 = vmatmul.mubr.msk.bf16.gmra.mrb[4].mxu1 %vm77_vm0, %v431_v8  ;;  %p439_p3 = por %p438_p2, %p437_p1 }
  0x10   :  { %p440_p4 = pnand %p439_p3, %p433_p0 }
  0xd9   :  { %v404_v9 = vpop.f32.mrb[0].mxu0  ;;  %v412_v10 = vpop.f32.mrb[0].mxu1 }
  0xda   :  { %v136_v11 = vpop.f32.mrb[1].mxu0  ;;  %v168_v12 = vpop.f32.mrb[1].mxu1 }
  0xdb   :  { %v405_v13 = vpop.f32.mrb[2].mxu0  ;;  %v413_v14 = vpop.f32.mrb[2].mxu1 }
  0xdc   :  { %v352_v15 = vpack.c.bf16 %v405_v13, %v404_v9  ;;  %v372_v16 = vpack.c.bf16 %v413_v14, %v412_v10  ;;  %v139_v17 = vpop.f32.mrb[3].mxu0  ;;  %v171_v18 = vpop.f32.mrb[3].mxu1 }
  0xdd   :  { %v347_v19 = vpack.c.bf16 %v139_v17, %v136_v11  ;;  %v367_v20 = vpack.c.bf16 %v171_v18, %v168_v12 }
  0xde   :  { %384 = vst [vmem:[#allocation2 + $0x8] sm:$0xff] %v352_v15   ;;  %388 = vst [vmem:[#allocation2 + $0x28] sm:$0xff] %v372_v16  }
  0xdf   :  { %348 = vst [vmem:[#allocation2] sm:$0xff] %v347_v19   ;;  %387 = vst [vmem:[#allocation2 + $0x20] sm:$0xff] %v367_v20  }
  0xe1   :  { %v408_v21 = vpop.f32.mrb[4].mxu0  ;;  %v416_v22 = vpop.f32.mrb[4].mxu1 }
  0xe2   :  { %v152_v23 = vpop.f32.mrb[5].mxu0  ;;  %v184_v24 = vpop.f32.mrb[5].mxu1 }
  0xe3   :  { %v409_v25 = vpop.f32.mrb[6].mxu0  ;;  %v417_v26 = vpop.f32.mrb[6].mxu1 }
  0xe4   :  { %v362_v27 = vpack.c.bf16 %v409_v25, %v408_v21  ;;  %v382_v28 = vpack.c.bf16 %v417_v26, %v416_v22  ;;  %v155_v29 = vpop.f32.mrb[7].mxu0  ;;  %v187_v30 = vpop.f32.mrb[7].mxu1 }
  0xe5   :  { %v357_v31 = vpack.c.bf16 %v155_v29, %v152_v23  ;;  %v377_v32 = vpack.c.bf16 %v187_v30, %v184_v24 }
  0xe6   :  { %386 = vst [vmem:[#allocation2 + $0x18] sm:$0xff] %v362_v27   ;;  %390 = vst [vmem:[#allocation2 + $0x38] sm:$0xff] %v382_v28  }
  0xe7   :  { %385 = vst [vmem:[#allocation2 + $0x10] sm:$0xff] %v357_v31   ;;  %389 = vst [vmem:[#allocation2 + $0x30] sm:$0xff] %v377_v32  }
  0xe8   :  { %443 = shalt.err (!%p440_p4)
}
  0xe9   :  { %s444_s30 = scalar_lea.hbm %s523_s2, 1024 }
  0xea   :  { %p445_p5 = scmp.ne.s32.totalorder %s523_s2, %s444_s30  ;;  %p448_p6 = scmp.lt.u32.totalorder %s444_s30, %s523_s2 }
  0xec   :  { %p450_p7 = pnand %p448_p6, %p445_p5 }
  0xee   :  { %453 = shalt.err (!%p450_p7)
}
  0xef   :  { %s457_s7 = smov 64   ;;  %s458_s8 = smov 4  }
  0xf0   :  { %290 = dma.vmem_to_hbm [thread:$0]  %s285_s26, 1024, %s523_s2, [#allocation3], %s457_s7, %s457_s7, %s458_s8  }
  0xf1   :  { %454 = dma.done.wait [#allocation3], 1024  }
  0xf2   :  { %455 = vsyncadd [#allocation3], 4294966272 }
  0xf3   :  { %294 = vsyncpa [#allocation3], 1 }

</bundles_post_ra>
